<compile_context>
chip_gen: v5e
topology: v5e:2x2
jax: 0.10.0
libtpu: 0.0.40
codegen_flags: <defaults>
</compile_context>

<pallas_src>
import jax
import jax.numpy as jnp
from jax import lax
from jax.experimental import pallas as pl
from jax.experimental.pallas import tpu as pltpu


def _critic_kernel(s_ref, a_ref, w1s_ref, w1a_ref, b1_ref, w2_ref, b2_ref,
                   w3_ref, b3_ref, o_ref):
    # Layer 1: Linear(state_size + action_size -> hidden) + ReLU, with the
    # [state, action] concat folded into two MXU matmuls on the split weight.
    h1 = (
        jnp.dot(s_ref[...], w1s_ref[...], preferred_element_type=jnp.float32)
        + jnp.dot(a_ref[...], w1a_ref[...], preferred_element_type=jnp.float32)
        + b1_ref[...]
    )
    h1 = jnp.maximum(h1, 0.0)

    # Layer 2: Linear(hidden -> hidden) + ReLU.
    h2 = jnp.dot(h1, w2_ref[...], preferred_element_type=jnp.float32) + b2_ref[...]
    h2 = jnp.maximum(h2, 0.0)

    # Layer 3: Linear(hidden -> 1) as a (1 x H) . (tb x H)^T MXU contraction
    # producing the (1, tb) lane-dense output row directly (no XLU reduce,
    # no sublane->lane relayout).
    q = lax.dot_general(
        w3_ref[...], h2,
        dimension_numbers=(((1,), (1,)), ((), ())),
        preferred_element_type=jnp.float32,
    )
    o_ref[...] = (q + b3_ref[0]).astype(o_ref.dtype)


def _round_up(x, m):
    return -(-x // m) * m


def critic_forward(state, action, params, *, batch_tile=4096):
    """Pallas implementation of Critic.forward(state, action) -> q.flatten()."""
    w1_s, w1_a, b1, w2, b2, w3, b3 = params
    batch, state_size = state.shape
    action_size = action.shape[1]
    hidden = w1_s.shape[1]

    # Batch tiling:
    #   * small batch (<= 256): a single full-extent tile.
    #   * otherwise: 128-multiple tiles, capped by batch_tile, and sized so
    #     there are at least 2 grid points (v7x 2-TC sharding).  No padding:
    #     the last block may be partial; OOB output columns are masked.
    if batch <= 256:
        tb = batch
    else:
        assert batch_tile % 128 == 0, "batch_tile must be a multiple of 128"
        tb = min(batch_tile, _round_up(pl.cdiv(batch, 2), 128))
    num_tiles = pl.cdiv(batch, tb)

    # Weights/biases: full-array blocks, constant index map -> VMEM-resident
    # across the whole grid (not re-fetched per tile).
    resident = lambda shape: pl.BlockSpec(shape, lambda i: (0,) * len(shape))

    flops = 2 * batch * hidden * (state_size + action_size + hidden + 1)
    bytes_accessed = 4 * (
        batch * (state_size + action_size + 1)
        + hidden * (state_size + action_size + hidden + 3)
        + 1
    )

    q_row = pl.pallas_call(
        _critic_kernel,
        out_shape=jax.ShapeDtypeStruct((1, batch), jnp.float32),
        grid=(num_tiles,),
        in_specs=[
            pl.BlockSpec((tb, state_size), lambda i: (i, 0)),
            pl.BlockSpec((tb, action_size), lambda i: (i, 0)),
            resident((state_size, hidden)),
            resident((action_size, hidden)),
            resident((1, hidden)),
            resident((hidden, hidden)),
            resident((1, hidden)),
            resident((1, hidden)),
            pl.BlockSpec(memory_space=pltpu.MemorySpace.SMEM),  # b3 scalar
        ],
        out_specs=pl.BlockSpec((1, tb), lambda i: (0, i)),
        compiler_params=pltpu.CompilerParams(
            dimension_semantics=("parallel",),
        ),
        cost_estimate=pl.CostEstimate(
            flops=flops, transcendentals=0, bytes_accessed=bytes_accessed),
    )(state, action, w1_s, w1_a, b1, w2, b2, w3, b3)

    return q_row.reshape(-1)  # torch .flatten()


def init_critic_params(key, state_size, action_size, hidden=256):
    """Deterministic init mimicking PyTorch nn.Linear default (U[-1/sqrt(fan_in), +])."""
    in_dim = state_size + action_size
    ks = jax.random.split(key, 6)

    def lin(kw, kb, fan_in, fan_out):
        bound = 1.0 / jnp.sqrt(jnp.float32(fan_in))
        w = jax.random.uniform(kw, (fan_in, fan_out), jnp.float32, -bound, bound)
        b = jax.random.uniform(kb, (1, fan_out), jnp.float32, -bound, bound)
        return w, b

    w1, b1 = lin(ks[0], ks[1], in_dim, hidden)
    w2, b2 = lin(ks[2], ks[3], hidden, hidden)
    w3c, b3c = lin(ks[4], ks[5], hidden, 1)
    # Layer-1 weight stored split so the kernel never needs the concat; the
    # final (hidden, 1) column stored as a (1, hidden) row for the MXU
    # contraction, and its bias as a (1,) SMEM scalar.
    w1_s, w1_a = w1[:state_size], w1[state_size:]
    w3 = w3c.reshape(1, hidden)
    b3 = b3c.reshape(1)
    return (w1_s, w1_a, b1, w2, b2, w3, b3)


def _ref_forward(state, action, params):
    w1_s, w1_a, b1, w2, b2, w3, b3 = params
    w1 = jnp.concatenate([w1_s, w1_a], axis=0)
    x = jnp.concatenate([state, action], axis=-1)
    h = jnp.maximum(x @ w1 + b1, 0.0)
    h = jnp.maximum(h @ w2 + b2, 0.0)
    return (h @ w3.T + b3).reshape(-1)


if __name__ == "__main__":
    key = jax.random.PRNGKey(0)
    k_state, k_action, k_params, k_s2, k_a2 = jax.random.split(key, 5)

    batch, state_size, action_size, hidden = 8, 12, 4, 32

    state = jax.random.normal(k_state, (batch, state_size), jnp.float32)
    action = jax.random.normal(k_action, (batch, action_size), jnp.float32)
    params = init_critic_params(k_params, state_size, action_size, hidden)

    # Small-batch path (single full-extent tile).
    q = critic_forward(state, action, params)
    jax.block_until_ready(q)
    ref = _ref_forward(state, action, params)
    assert q.shape == (batch,)
    assert jnp.allclose(q, ref, atol=1e-5), "mismatch vs reference (small batch)"

    # Larger batch: >=2-tile parallel grid (v7x 2-TC) with a partial last
    # block (no wrapper-side padding copy).
    big = 600
    s2 = jax.random.normal(k_s2, (big, state_size), jnp.float32)
    a2 = jax.random.normal(k_a2, (big, action_size), jnp.float32)
    q2 = critic_forward(s2, a2, params)
    jax.block_until_ready(q2)
    ref2 = _ref_forward(s2, a2, params)
    assert q2.shape == (big,)
    assert jnp.allclose(q2, ref2, atol=1e-4), "mismatch vs reference (auto tiles)"

    # Caller-capped tile size: 5 tiles of 128 rows, ragged tail still padless.
    q3 = critic_forward(s2, a2, params, batch_tile=128)
    jax.block_until_ready(q3)
    assert q3.shape == (big,)
    assert jnp.allclose(q3, ref2, atol=1e-4), "mismatch vs reference (capped tiles)"

    print("KERNEL_OK")
</pallas_src>

<mosaic_0001>
module attributes {stable_mosaic.version = 11 : i64} {
  func.func @_critic_kernel(%arg0: i32, %arg1: memref<8x12xf32, #tpu.memory_space<vmem>>, %arg2: memref<8x4xf32, #tpu.memory_space<vmem>>, %arg3: memref<12x32xf32, #tpu.memory_space<vmem>>, %arg4: memref<4x32xf32, #tpu.memory_space<vmem>>, %arg5: memref<1x32xf32, #tpu.memory_space<vmem>>, %arg6: memref<32x32xf32, #tpu.memory_space<vmem>>, %arg7: memref<1x32xf32, #tpu.memory_space<vmem>>, %arg8: memref<1x32xf32, #tpu.memory_space<vmem>>, %arg9: memref<1xf32, #tpu.memory_space<smem>>, %arg10: memref<1x8xf32, #tpu.memory_space<vmem>>) attributes {dimension_semantics = [#tpu.dimension_semantics<parallel>], iteration_bounds = array<i64: 1>, scalar_prefetch = 0 : i64, scratch_operands = 0 : i64, tpu.core_type = #tpu.core_type<tc>, window_params = [{transform_indices = @transform_0, window_bounds = array<i64: 8, 12>}, {transform_indices = @transform_1, window_bounds = array<i64: 8, 4>}, {pipeline_mode = #tpu.pipeline_mode<synchronous>, transform_indices = @transform_2, window_bounds = array<i64: 12, 32>}, {pipeline_mode = #tpu.pipeline_mode<synchronous>, transform_indices = @transform_3, window_bounds = array<i64: 4, 32>}, {pipeline_mode = #tpu.pipeline_mode<synchronous>, transform_indices = @transform_4, window_bounds = array<i64: 1, 32>}, {pipeline_mode = #tpu.pipeline_mode<synchronous>, transform_indices = @transform_5, window_bounds = array<i64: 32, 32>}, {pipeline_mode = #tpu.pipeline_mode<synchronous>, transform_indices = @transform_6, window_bounds = array<i64: 1, 32>}, {pipeline_mode = #tpu.pipeline_mode<synchronous>, transform_indices = @transform_7, window_bounds = array<i64: 1, 32>}, {transform_indices = @transform_8, window_bounds = array<i64: 1>}, {transform_indices = @transform_9, window_bounds = array<i64: 1, 8>}]} {
    %c0 = arith.constant 0 : index
    %c0_0 = arith.constant 0 : index
    %0 = vector.load %arg1[%c0, %c0_0] : memref<8x12xf32, #tpu.memory_space<vmem>>, vector<8x12xf32>
    %c0_1 = arith.constant 0 : index
    %c0_2 = arith.constant 0 : index
    %1 = vector.load %arg3[%c0_1, %c0_2] : memref<12x32xf32, #tpu.memory_space<vmem>>, vector<12x32xf32>
    %cst = arith.constant dense<0.000000e+00> : vector<8x32xf32>
    %2 = tpu.matmul %0, %1, %cst {dimension_numbers = #tpu.dot_dimension_numbers<[1], [0], [0], [1], [0, 0, 1, 1], [], []>} : vector<8x12xf32>, vector<12x32xf32>, vector<8x32xf32> -> vector<8x32xf32>
    %c0_3 = arith.constant 0 : index
    %c0_4 = arith.constant 0 : index
    %3 = vector.load %arg2[%c0_3, %c0_4] : memref<8x4xf32, #tpu.memory_space<vmem>>, vector<8x4xf32>
    %c0_5 = arith.constant 0 : index
    %c0_6 = arith.constant 0 : index
    %4 = vector.load %arg4[%c0_5, %c0_6] : memref<4x32xf32, #tpu.memory_space<vmem>>, vector<4x32xf32>
    %cst_7 = arith.constant dense<0.000000e+00> : vector<8x32xf32>
    %5 = tpu.matmul %3, %4, %cst_7 {dimension_numbers = #tpu.dot_dimension_numbers<[1], [0], [0], [1], [0, 0, 1, 1], [], []>} : vector<8x4xf32>, vector<4x32xf32>, vector<8x32xf32> -> vector<8x32xf32>
    %6 = arith.addf %2, %5 : vector<8x32xf32>
    %c0_8 = arith.constant 0 : index
    %c0_9 = arith.constant 0 : index
    %7 = vector.load %arg5[%c0_8, %c0_9] : memref<1x32xf32, #tpu.memory_space<vmem>>, vector<1x32xf32>
    %8 = vector.broadcast %7 : vector<1x32xf32> to vector<8x32xf32>
    %9 = arith.addf %6, %8 : vector<8x32xf32>
    %cst_10 = arith.constant 0.000000e+00 : f32
    %10 = vector.broadcast %cst_10 : f32 to vector<8x32xf32>
    %11 = arith.maximumf %9, %10 : vector<8x32xf32>
    %c0_11 = arith.constant 0 : index
    %c0_12 = arith.constant 0 : index
    %12 = vector.load %arg6[%c0_11, %c0_12] : memref<32x32xf32, #tpu.memory_space<vmem>>, vector<32x32xf32>
    %cst_13 = arith.constant dense<0.000000e+00> : vector<8x32xf32>
    %13 = tpu.matmul %11, %12, %cst_13 {dimension_numbers = #tpu.dot_dimension_numbers<[1], [0], [0], [1], [0, 0, 1, 1], [], []>} : vector<8x32xf32>, vector<32x32xf32>, vector<8x32xf32> -> vector<8x32xf32>
    %c0_14 = arith.constant 0 : index
    %c0_15 = arith.constant 0 : index
    %14 = vector.load %arg7[%c0_14, %c0_15] : memref<1x32xf32, #tpu.memory_space<vmem>>, vector<1x32xf32>
    %15 = vector.broadcast %14 : vector<1x32xf32> to vector<8x32xf32>
    %16 = arith.addf %13, %15 : vector<8x32xf32>
    %cst_16 = arith.constant 0.000000e+00 : f32
    %17 = vector.broadcast %cst_16 : f32 to vector<8x32xf32>
    %18 = arith.maximumf %16, %17 : vector<8x32xf32>
    %c0_17 = arith.constant 0 : index
    %c0_18 = arith.constant 0 : index
    %19 = vector.load %arg8[%c0_17, %c0_18] : memref<1x32xf32, #tpu.memory_space<vmem>>, vector<1x32xf32>
    %cst_19 = arith.constant dense<0.000000e+00> : vector<1x8xf32>
    %20 = tpu.matmul %19, %18, %cst_19 {dimension_numbers = #tpu.dot_dimension_numbers<[1], [1], [0], [0], [0, 0, 1, 0], [], []>} : vector<1x32xf32>, vector<8x32xf32>, vector<1x8xf32> -> vector<1x8xf32>
    %c0_20 = arith.constant 0 : index
    %21 = memref.load %arg9[%c0_20] : memref<1xf32, #tpu.memory_space<smem>>
    %22 = vector.broadcast %21 : f32 to vector<1x8xf32>
    %23 = arith.addf %20, %22 : vector<1x8xf32>
    %c0_21 = arith.constant 0 : index
    %c0_22 = arith.constant 0 : index
    %24 = vector.load %arg10[%c0_21, %c0_22] : memref<1x8xf32, #tpu.memory_space<vmem>>, vector<1x8xf32>
    tpu.vector_store %arg10[%c0_21, %c0_22], %23 {strides = array<i32>} : memref<1x8xf32, #tpu.memory_space<vmem>>, vector<1x8xf32>,
    return
  }
  func.func @transform_0(%arg0: i32) -> (i32, i32) {
    %c0_i32 = arith.constant 0 : i32
    %c0_i32_0 = arith.constant 0 : i32
    return %arg0, %c0_i32 : i32, i32
  }
  func.func @transform_1(%arg0: i32) -> (i32, i32) {
    %c0_i32 = arith.constant 0 : i32
    %c0_i32_0 = arith.constant 0 : i32
    return %arg0, %c0_i32 : i32, i32
  }
  func.func @transform_2(%arg0: i32) -> (i32, i32) {
    %c0_i32 = arith.constant 0 : i32
    %c0_i32_0 = arith.constant 0 : i32
    %c0_i32_1 = arith.constant 0 : i32
    return %c0_i32, %c0_i32_0 : i32, i32
  }
  func.func @transform_3(%arg0: i32) -> (i32, i32) {
    %c0_i32 = arith.constant 0 : i32
    %c0_i32_0 = arith.constant 0 : i32
    %c0_i32_1 = arith.constant 0 : i32
    return %c0_i32, %c0_i32_0 : i32, i32
  }
  func.func @transform_4(%arg0: i32) -> (i32, i32) {
    %c0_i32 = arith.constant 0 : i32
    %c0_i32_0 = arith.constant 0 : i32
    %c0_i32_1 = arith.constant 0 : i32
    return %c0_i32, %c0_i32_0 : i32, i32
  }
  func.func @transform_5(%arg0: i32) -> (i32, i32) {
    %c0_i32 = arith.constant 0 : i32
    %c0_i32_0 = arith.constant 0 : i32
    %c0_i32_1 = arith.constant 0 : i32
    return %c0_i32, %c0_i32_0 : i32, i32
  }
  func.func @transform_6(%arg0: i32) -> (i32, i32) {
    %c0_i32 = arith.constant 0 : i32
    %c0_i32_0 = arith.constant 0 : i32
    %c0_i32_1 = arith.constant 0 : i32
    return %c0_i32, %c0_i32_0 : i32, i32
  }
  func.func @transform_7(%arg0: i32) -> (i32, i32) {
    %c0_i32 = arith.constant 0 : i32
    %c0_i32_0 = arith.constant 0 : i32
    %c0_i32_1 = arith.constant 0 : i32
    return %c0_i32, %c0_i32_0 : i32, i32
  }
  func.func @transform_8(%arg0: i32) -> i32 {
    %c0_i32 = arith.constant 0 : i32
    %c0_i32_0 = arith.constant 0 : i32
    return %c0_i32 : i32
  }
  func.func @transform_9(%arg0: i32) -> (i32, i32) {
    %c0_i32 = arith.constant 0 : i32
    %c0_i32_0 = arith.constant 0 : i32
    return %c0_i32, %arg0 : i32, i32
  }
}

</mosaic_0001>

<bundles_post_ra>
// kernel: tpu_custom_call.1
= control target key start
LH: loop header
LB: loop body
LE: loop exit
PB: predicated region body
PF: predicated region fallthrough
CT: control target
= control target key end

     0   :  { %15 = vsyncpa [#allocation4], 0  ;;  %s391_s0 = inlined_call_operand.vmem [shape: f32[8,12], index: 0, kind: input, shape index: {}]   ;;  %s392_s1 = inlined_call_operand.vmem [shape: f32[8,4], index: 1, kind: input, shape index: {}]   ;;  %s393_s2 = inlined_call_operand.hbm [shape: f32[12,32], index: 2, kind: input, shape index: {}]   ;;  %s394_s3 = inlined_call_operand.vmem [shape: f32[4,32], index: 3, kind: input, shape index: {}]   ;;  %s395_s4 = inlined_call_operand.vmem [shape: f32[1,32], index: 4, kind: input, shape index: {}]   ;;  %s396_s5 = inlined_call_operand.hbm [shape: f32[32,32], index: 5, kind: input, shape index: {}]   ;;  %s397_s6 = inlined_call_operand.vmem [shape: f32[1,32], index: 6, kind: input, shape index: {}]   ;;  %s398_s7 = inlined_call_operand.vmem [shape: f32[1,32], index: 7, kind: input, shape index: {}]   ;;  %s399_s8 = inlined_call_operand.<no memory space> [shape: f32[1], index: 8, kind: input, shape index: {}]   ;;  %s400_s9 = inlined_call_operand.hbm [shape: f32[1,8], index: 9, kind: output, shape index: {}]  }
   0x1   :  { %16 = vsyncpa [#allocation7], 0 }
   0x2   :  { %17 = vsyncpa [#allocation5], 0  ;;  %s26_s11 = sshll.u32 %s393_s2, 4  ;;  %s306_s12 = smov [#allocation3]   ;;  %s27_s11 = int_to_ptr.hbm [resolvable:$true] %s26_s11 }
   0x3   :  { %s28_s13 = sshll.u32 %s306_s12, 4  ;;  %s43_s16 = sshll.u32 %s396_s5, 4  ;;  %s29_s13 = int_to_ptr.vmem [resolvable:$true] %s28_s13  ;;  %s44_s16 = int_to_ptr.hbm [resolvable:$true] %s43_s16 }
   0x4   :  { %s307_s17 = smov 128   ;;  %s308_s18 = smov 8  }
   0x5   :  { %34 = dma.hbm_to_vmem [thread:$0]  %s27_s11, 256, %s29_s13, [#allocation4], %s307_s17, %s307_s17, %s308_s18  }
   0x6   :  { %s309_s19 = smov [#allocation6]  }
   0x7   :  { %s45_s20 = sshll.u32 %s309_s19, 4  ;;  %s46_s20 = int_to_ptr.vmem [resolvable:$true] %s45_s20 }
   0x8   :  { %51 = dma.hbm_to_vmem [thread:$0]  %s44_s16, 512, %s46_s20, [#allocation7], %s307_s17, %s307_s17, %s308_s18  }
   0x9   :  { %300 = dma.done.wait [#allocation4], 256  }
   0xa   :  { %301 = vsyncadd [#allocation4], 4294967040 }
   0xb   :  { %302 = dma.done.wait [#allocation7], 512  }
   0xc   :  { %303 = vsyncadd [#allocation7], 4294966784  ;;  %vm75_vm0 = vcmask 1043456   ;;  %vm71_vm1 = vcmask 31744   ;;  %v68_v0 = vld [vmem:[#allocation3 + $0x8] sm:$0xf]  ;;  %v167_v20 = vstv %s399_s8 }
   0xd   :  { %v70_v1 = vld [vmem:[%s394_s3] sm:$0xf]  ;;  %216 = vmatpush.msk.msra.mxu1 %vm75_vm0, %v68_v0  ;;  %vm99_vm2 = vcmask 97280   ;;  %v135_v5 = vld [vmem:[#allocation6 + $0x18] sm:$0xff]  ;;  %v133_v7 = vld [vmem:[#allocation6 + $0x8] sm:$0xff]  ;;  %vm140_vm3 = vcmask 261120  }
   0xe   :  { %v67_v2 = vld [vmem:[#allocation3] sm:$0xff]  ;;  %214 = vmatpush.msk.msra.mxu0 %vm75_vm0, %v70_v1  ;;  %156 = vmatpush.msra.mxu2 %v135_v5  ;;  %v132_v8 = vld [vmem:[#allocation6] sm:$0xff]  ;;  %s310_s29 = smov [#allocation8]   ;;  %s203_s12 = sshll.u32 %s400_s9, 4  ;;  %vm194_vm4 = vcmask 57344   ;;  %s204_s12 = int_to_ptr.hbm [resolvable:$true] %s203_s12 }
   0xf   :  { %v69_v3 = vld [vmem:[%s392_s1] sm:$0xff]  ;;  %121 = vmatpush.msra.mxu1 %v67_v2  ;;  %s201_s30 = sshll.u32 %s310_s29, 4  ;;  %s202_s30 = int_to_ptr.vmem [resolvable:$true] %s201_s30 }
  0x10   :  { %v66_v4 = vld [vmem:[%s391_s0] sm:$0xff]  ;;  %215 = vmatmul.msk.f32.vlgmr.msra.gmra.mxu0 %vm71_vm1, %v69_v3 }
  0x11   :  { %217 = vmatmul.msk.f32.vlgmr.msra.gmra.mxu1 %vm99_vm2, %v66_v4  ;;  %v134_v6 = vld [vmem:[#allocation6 + $0x10] sm:$0xff] }
  0x12   :  { %157 = vmatpush.msra.mxu2 %v134_v6  ;;  %v226_v10 = vld [vmem:[%s395_s4] ss:$0 sm:$0xff] }
  0x13   :  { %v227_v15 = vld [vmem:[%s397_s6] ss:$0 sm:$0xff] }
  0x14   :  { %158 = vmatpush.msra.mxu2 %v133_v7  ;;  %v165_v19 = vld [vmem:[%s398_s7] sm:$0x1] }
  0x16   :  { %159 = vmatpush.msra.mxu2 %v132_v8 }
  0x8d   :  { %v96_v9 = vpop.f32.mrf.mxu0 }
  0x8e   :  { %v123_v11 = vpop.f32.mrf.mxu1 }
  0x8f   :  { %v124_v12 = vadd.f32 %v123_v11, %v96_v9 }
  0x91   :  { %v130_v13 = vadd.f32 %v226_v10, %v124_v12 }
  0x93   :  { %v131_v14 = vmax.f32 %v130_v13, 0.0 }
  0x95   :  { %218 = vmatmul.msk.f32.vlgmr.msra.gmra.mxu2 %vm140_vm3, %v131_v14 }
 0x118   :  { %v161_v16 = vpop.f32.mrf.mxu2 }
 0x119   :  { %v162_v17 = vadd.f32 %v227_v15, %v161_v16 }
 0x11b   :  { %v164_v18 = vmax.f32 %v162_v17, 0.0 }
 0x11d   :  { %219 = vmatpush.xpose.msk.msra.mxu3 %vm140_vm3, %v164_v18 }
 0x120   :  { %220 = vmatmul.msk.f32.vlgmr.msra.gmra.mxu3 %vm140_vm3, %v165_v19 }
 0x1a3   :  { %v191_v21 = vpop.f32.mrf.mxu3 }
 0x1a4   :  { %v192_v22 = vadd.f32 %v191_v21, %v167_v20 }
 0x1a6   :  { %195 = vst.msk [vmem:[#allocation8] sm:$0x1] %vm194_vm4, %v192_v22 }
 0x1a7   :  { %206 = dma.vmem_to_hbm [thread:$0]  %s202_s30, 16, %s204_s12, [#allocation5]  }
 0x1a8   :  { %304 = dma.done.wait [#allocation5], 16  }
 0x1a9   :  { %305 = vsyncadd [#allocation5], 4294967280 }
 0x1aa   :  { %211 = vsyncpa [#allocation4], 1 }
 0x1ab   :  { %212 = vsyncpa [#allocation7], 1 }
 0x1ac   :  { %213 = vsyncpa [#allocation5], 1 }

</bundles_post_ra>
